<compile_context>
chip_gen: v6e
topology: v6e:2x2x1
jax: 0.10.0
libtpu: 0.0.40
codegen_flags: <defaults>
</compile_context>

<pallas_src>
import math

import jax
import jax.numpy as jnp
from jax.experimental import pallas as pl
from jax.experimental.pallas import tpu as pltpu


def _round_up(v, m):
    return ((v + m - 1) // m) * m


# ---- shared-range-reduction sin/cos (Cephes single-precision constants) ----
_TWO_OVER_PI = 0.6366197723675814
_PI2_A = 1.5703125                   # pi/2 split so n * _PI2_A is exact in f32
_PI2_B = 4.837512969970703125e-4
_PI2_C = 7.54978995489188216e-8


def _sincos(z):
    """sin(z), cos(z) computed from one shared range reduction (VPU only)."""
    n = jnp.floor(z * _TWO_OVER_PI + 0.5)          # nearest quadrant
    r = z - n * _PI2_A
    r = r - n * _PI2_B
    r = r - n * _PI2_C                             # r in ~[-pi/4, pi/4]
    q = n.astype(jnp.int32)

    r2 = r * r
    sin_r = r + r * r2 * (
        (-1.9515295891e-4 * r2 + 8.3321608736e-3) * r2 - 1.6666654611e-1)
    cos_r = 1.0 - 0.5 * r2 + r2 * r2 * (
        (2.443315711809948e-5 * r2 - 1.388731625493765e-3) * r2
        + 4.166664568298827e-2)

    swap = (q & 1) == 1                            # quadrants 1, 3
    sin_mag = jnp.where(swap, cos_r, sin_r)
    cos_mag = jnp.where(swap, sin_r, cos_r)
    s = jnp.where((q & 2) == 2, -sin_mag, sin_mag)         # negate in q = 2, 3
    c = jnp.where(((q + 1) & 2) == 2, -cos_mag, cos_mag)   # negate in q = 1, 2
    return s, c


def _rff_kernel(x_ref, bt_ref, o_ref):
    # x_ref : (TN, in)     VMEM
    # bt_ref: (in, Hp)     VMEM (constant index map -> fetched once, resident)
    # o_ref : (TN, 2*Hp)   VMEM
    z = jnp.dot(x_ref[...], bt_ref[...], preferred_element_type=jnp.float32)
    hp = z.shape[-1]                               # static, multiple of 128
    s, c = _sincos(z)
    # Both stores start on a 128-lane boundary (Hp % 128 == 0): no masked stores.
    o_ref[:, :hp] = s.astype(o_ref.dtype)
    o_ref[:, hp:] = c.astype(o_ref.dtype)


_VMEM_BUDGET = 48 << 20   # safe under v7x's 64 MiB physical VMEM; tiny vs 128 MiB on v5e/v6e


def _pick_tn(n, in_features, hp, x_bytes, w_bytes, o_bytes):
    """Row-tile size: VMEM-budget aware, >=2 grid points when possible."""
    if n <= 8:
        return max(n, 1)
    # The pipeline double-buffers the x and out blocks; the weight has a
    # constant index map but still gets two buffers -> count it twice.
    weight = 2 * in_features * hp * w_bytes
    per_row = 2 * (in_features * x_bytes + 2 * hp * o_bytes)
    avail = max(_VMEM_BUDGET - weight, 8 * per_row)
    tn = avail // per_row
    tn = max(8, min(1024, (tn // 8) * 8))
    if tn >= 128:
        tn = (tn // 128) * 128        # keep MXU rows well fed
    # Ensure at least 2 grid points so v7x's second TensorCore is not idle.
    tn = min(tn, _round_up(-(-n // 2), 8))
    return int(tn)


def rff_forward(x, bt, h, *, matmul_dtype=None):
    """x: (..., in).  bt: (in, Hp) pre-padded/transposed weight.  Returns (..., 2*h)."""
    in_features = x.shape[-1]
    hp = bt.shape[1]
    lead = x.shape[:-1]
    n = 1
    for d in lead:
        n *= d

    x2 = x.reshape(n, in_features)
    if matmul_dtype is not None:
        x2 = x2.astype(matmul_dtype)
        bt = bt.astype(matmul_dtype)

    out_dtype = x.dtype
    tn = _pick_tn(n, in_features, hp, x2.dtype.itemsize, bt.dtype.itemsize,
                  out_dtype.itemsize)
    grid = (pl.cdiv(n, tn),)

    weight_bytes = 2 * in_features * hp * bt.dtype.itemsize
    block_bytes = 2 * tn * (in_features * x2.dtype.itemsize
                            + 2 * hp * out_dtype.itemsize)
    vmem_limit = int(min(max(weight_bytes + block_bytes + (2 << 20), 32 << 20),
                         56 << 20))

    cost = pl.CostEstimate(
        flops=2 * n * hp * in_features,
        transcendentals=0,   # sin/cos are VPU polynomials, no EUP calls
        bytes_accessed=(n * in_features * x2.dtype.itemsize
                        + in_features * hp * bt.dtype.itemsize
                        + n * 2 * hp * out_dtype.itemsize),
    )

    out = pl.pallas_call(
        _rff_kernel,
        out_shape=jax.ShapeDtypeStruct((n, 2 * hp), out_dtype),
        grid_spec=pl.GridSpec(
            grid=grid,
            in_specs=[
                pl.BlockSpec((tn, in_features), lambda i: (i, 0)),
                # Constant index map: fetched once, VMEM-resident across grid.
                # TODO(synk): pipeline_mode=pl.Buffered(1) would drop the
                # never-used second weight buffer; left default for robustness.
                pl.BlockSpec((in_features, hp), lambda i: (0, 0)),
            ],
            out_specs=pl.BlockSpec((tn, 2 * hp), lambda i: (i, 0)),
        ),
        compiler_params=pltpu.CompilerParams(
            dimension_semantics=("parallel",),
            vmem_limit_bytes=vmem_limit,
        ),
        cost_estimate=cost,
    )(x2, bt)

    if hp == h:
        y = out                       # fast path: output is already [sin | cos]
    else:
        # Drop the padded columns of each half and rebuild concat(sin, cos).
        y = jnp.concatenate([out[:, :h], out[:, hp:hp + h]], axis=-1)
    return y.reshape(*lead, 2 * h)


class RFF:
    """JAX/Pallas port of the PyTorch RFF module."""

    def __init__(self, in_features, out_features, sigma=1.0, key=None,
                 matmul_dtype=None):
        self.sigma = sigma
        self.in_features = in_features
        self.out_features = out_features
        self.compensation = 1 if (out_features % 2 != 0) else 0
        # matmul_dtype=jnp.bfloat16 halves DMA/VMEM for the dot on v6e/v7x
        # (f32 accumulate, f32 sin/cos); default None keeps full f32 numerics.
        self.matmul_dtype = matmul_dtype
        if key is None:
            key = jax.random.PRNGKey(42)
        h = out_features // 2 + self.compensation
        b = jax.random.normal(key, (h, in_features), dtype=jnp.float32) * sigma
        b = b / math.sqrt(2.0)
        self.B = b                    # reference-layout weight (H, in)
        self.H = h
        # Pad H to a lane-dense multiple of 128 (zero rows -> sin 0 / cos 1 in
        # the discarded columns) and transpose ONCE at construction time.
        hp = _round_up(h, 128)
        bt = b
        if hp != h:
            bt = jnp.pad(bt, ((0, hp - h), (0, 0)))
        self.bt = jnp.asarray(bt.T)   # (in_features, Hp)
        # TODO(synk): for very large Hp a second grid axis tiling Hp into
        # 128-multiple column chunks would bound VMEM further; not needed for
        # typical RFF sizes so the row-only grid is kept.

    def __call__(self, x):
        y = rff_forward(x, self.bt, self.H, matmul_dtype=self.matmul_dtype)
        if self.compensation:
            y = y[..., :-1]
        return y


def _reference(x, B, compensation):
    z = jnp.einsum("...k,hk->...h", x, B)
    y = jnp.concatenate([jnp.sin(z), jnp.cos(z)], axis=-1)
    if compensation:
        y = y[..., :-1]
    return y


if __name__ == "__main__":
    key = jax.random.PRNGKey(0)
    kx, kb1, kb2, kb3 = jax.random.split(key, 4)

    batch, seq, in_features = 2, 8, 32
    x = jax.random.normal(kx, (batch, seq, in_features), dtype=jnp.float32)

    # Case 1: even out_features, H < 128 -> padded Hp / concat path.
    rff1 = RFF(in_features, 64, sigma=1.0, key=kb1)
    y1 = jax.block_until_ready(rff1(x))
    assert y1.shape == (batch, seq, 64), y1.shape
    r1 = _reference(x, rff1.B, rff1.compensation)
    assert jnp.allclose(y1, r1, atol=1e-5, rtol=1e-5), float(jnp.max(jnp.abs(y1 - r1)))

    # Case 2: H == 128 -> fast path (no wrapper concat).
    rff2 = RFF(in_features, 256, sigma=1.0, key=kb2)
    y2 = jax.block_until_ready(rff2(x))
    assert y2.shape == (batch, seq, 256), y2.shape
    r2 = _reference(x, rff2.B, rff2.compensation)
    assert jnp.allclose(y2, r2, atol=1e-5, rtol=1e-5), float(jnp.max(jnp.abs(y2 - r2)))

    # Case 3: odd out_features -> compensation trim.
    rff3 = RFF(in_features, 33, sigma=1.0, key=kb3)
    y3 = jax.block_until_ready(rff3(x))
    assert y3.shape == (batch, seq, 33), y3.shape
    r3 = _reference(x, rff3.B, rff3.compensation)
    assert jnp.allclose(y3, r3, atol=1e-5, rtol=1e-5), float(jnp.max(jnp.abs(y3 - r3)))

    print("KERNEL_OK")
</pallas_src>

<mosaic_0001>
module attributes {stable_mosaic.version = 11 : i64} {
  func.func @_rff_kernel(%arg0: i32, %arg1: memref<8x32xf32, #tpu.memory_space<vmem>>, %arg2: memref<32x128xf32, #tpu.memory_space<vmem>>, %arg3: memref<8x256xf32, #tpu.memory_space<vmem>>) attributes {dimension_semantics = [#tpu.dimension_semantics<parallel>], iteration_bounds = array<i64: 2>, scalar_prefetch = 0 : i64, scratch_operands = 0 : i64, tpu.core_type = #tpu.core_type<tc>, window_params = [{transform_indices = @transform_0, window_bounds = array<i64: 8, 32>}, {pipeline_mode = #tpu.pipeline_mode<synchronous>, transform_indices = @transform_1, window_bounds = array<i64: 32, 128>}, {transform_indices = @transform_2, window_bounds = array<i64: 8, 256>}]} {
    %c0 = arith.constant 0 : index
    %c0_0 = arith.constant 0 : index
    %0 = vector.load %arg1[%c0, %c0_0] : memref<8x32xf32, #tpu.memory_space<vmem>>, vector<8x32xf32>
    %c0_1 = arith.constant 0 : index
    %c0_2 = arith.constant 0 : index
    %1 = vector.load %arg2[%c0_1, %c0_2] : memref<32x128xf32, #tpu.memory_space<vmem>>, vector<32x128xf32>
    %cst = arith.constant dense<0.000000e+00> : vector<8x128xf32>
    %2 = tpu.matmul %0, %1, %cst {dimension_numbers = #tpu.dot_dimension_numbers<[1], [0], [0], [1], [0, 0, 1, 1], [], []>} : vector<8x32xf32>, vector<32x128xf32>, vector<8x128xf32> -> vector<8x128xf32>
    %cst_3 = arith.constant 0.636619746 : f32
    %3 = vector.broadcast %cst_3 : f32 to vector<8x128xf32>
    %4 = arith.mulf %2, %3 : vector<8x128xf32>
    %cst_4 = arith.constant 5.000000e-01 : f32
    %5 = vector.broadcast %cst_4 : f32 to vector<8x128xf32>
    %6 = arith.addf %4, %5 : vector<8x128xf32>
    %7 = math.floor %6 : vector<8x128xf32>
    %cst_5 = arith.constant 1.5703125 : f32
    %8 = vector.broadcast %cst_5 : f32 to vector<8x128xf32>
    %9 = arith.mulf %7, %8 : vector<8x128xf32>
    %10 = arith.subf %2, %9 : vector<8x128xf32>
    %cst_6 = arith.constant 4.83751297E-4 : f32
    %11 = vector.broadcast %cst_6 : f32 to vector<8x128xf32>
    %12 = arith.mulf %7, %11 : vector<8x128xf32>
    %13 = arith.subf %10, %12 : vector<8x128xf32>
    %cst_7 = arith.constant 7.549790e-08 : f32
    %14 = vector.broadcast %cst_7 : f32 to vector<8x128xf32>
    %15 = arith.mulf %7, %14 : vector<8x128xf32>
    %16 = arith.subf %13, %15 : vector<8x128xf32>
    %17 = arith.fptosi %7 : vector<8x128xf32> to vector<8x128xi32>
    %18 = arith.mulf %16, %16 : vector<8x128xf32>
    %19 = arith.mulf %16, %18 : vector<8x128xf32>
    %cst_8 = arith.constant -1.95152956E-4 : f32
    %20 = vector.broadcast %cst_8 : f32 to vector<8x128xf32>
    %21 = arith.mulf %20, %18 : vector<8x128xf32>
    %cst_9 = arith.constant 0.00833216123 : f32
    %22 = vector.broadcast %cst_9 : f32 to vector<8x128xf32>
    %23 = arith.addf %21, %22 : vector<8x128xf32>
    %24 = arith.mulf %23, %18 : vector<8x128xf32>
    %cst_10 = arith.constant 0.166666552 : f32
    %25 = vector.broadcast %cst_10 : f32 to vector<8x128xf32>
    %26 = arith.subf %24, %25 : vector<8x128xf32>
    %27 = arith.mulf %19, %26 : vector<8x128xf32>
    %28 = arith.addf %16, %27 : vector<8x128xf32>
    %cst_11 = arith.constant 5.000000e-01 : f32
    %29 = vector.broadcast %cst_11 : f32 to vector<8x128xf32>
    %30 = arith.mulf %29, %18 : vector<8x128xf32>
    %cst_12 = arith.constant 1.000000e+00 : f32
    %31 = vector.broadcast %cst_12 : f32 to vector<8x128xf32>
    %32 = arith.subf %31, %30 : vector<8x128xf32>
    %33 = arith.mulf %18, %18 : vector<8x128xf32>
    %cst_13 = arith.constant 2.44331568E-5 : f32
    %34 = vector.broadcast %cst_13 : f32 to vector<8x128xf32>
    %35 = arith.mulf %34, %18 : vector<8x128xf32>
    %cst_14 = arith.constant 0.00138873165 : f32
    %36 = vector.broadcast %cst_14 : f32 to vector<8x128xf32>
    %37 = arith.subf %35, %36 : vector<8x128xf32>
    %38 = arith.mulf %37, %18 : vector<8x128xf32>
    %cst_15 = arith.constant 0.0416666456 : f32
    %39 = vector.broadcast %cst_15 : f32 to vector<8x128xf32>
    %40 = arith.addf %38, %39 : vector<8x128xf32>
    %41 = arith.mulf %33, %40 : vector<8x128xf32>
    %42 = arith.addf %32, %41 : vector<8x128xf32>
    %c1_i32 = arith.constant 1 : i32
    %43 = vector.broadcast %c1_i32 : i32 to vector<8x128xi32>
    %44 = arith.andi %17, %43 : vector<8x128xi32>
    %c1_i32_16 = arith.constant 1 : i32
    %45 = vector.broadcast %c1_i32_16 : i32 to vector<8x128xi32>
    %46 = arith.cmpi eq, %44, %45 : vector<8x128xi32>
    %47 = arith.select %46, %42, %28 : vector<8x128xi1>, vector<8x128xf32>
    %48 = arith.select %46, %28, %42 : vector<8x128xi1>, vector<8x128xf32>
    %c2_i32 = arith.constant 2 : i32
    %49 = vector.broadcast %c2_i32 : i32 to vector<8x128xi32>
    %50 = arith.andi %17, %49 : vector<8x128xi32>
    %c2_i32_17 = arith.constant 2 : i32
    %51 = vector.broadcast %c2_i32_17 : i32 to vector<8x128xi32>
    %52 = arith.cmpi eq, %50, %51 : vector<8x128xi32>
    %cst_18 = arith.constant 0.000000e+00 : f32
    %53 = vector.broadcast %cst_18 : f32 to vector<8x128xf32>
    %54 = arith.subf %53, %47 : vector<8x128xf32>
    %55 = arith.select %52, %54, %47 : vector<8x128xi1>, vector<8x128xf32>
    %c1_i32_19 = arith.constant 1 : i32
    %56 = vector.broadcast %c1_i32_19 : i32 to vector<8x128xi32>
    %57 = arith.addi %17, %56 : vector<8x128xi32>
    %c2_i32_20 = arith.constant 2 : i32
    %58 = vector.broadcast %c2_i32_20 : i32 to vector<8x128xi32>
    %59 = arith.andi %57, %58 : vector<8x128xi32>
    %c2_i32_21 = arith.constant 2 : i32
    %60 = vector.broadcast %c2_i32_21 : i32 to vector<8x128xi32>
    %61 = arith.cmpi eq, %59, %60 : vector<8x128xi32>
    %cst_22 = arith.constant 0.000000e+00 : f32
    %62 = vector.broadcast %cst_22 : f32 to vector<8x128xf32>
    %63 = arith.subf %62, %48 : vector<8x128xf32>
    %64 = arith.select %61, %63, %48 : vector<8x128xi1>, vector<8x128xf32>
    %c0_23 = arith.constant 0 : index
    %c0_24 = arith.constant 0 : index
    %65 = vector.load %arg3[%c0_23, %c0_24] : memref<8x256xf32, #tpu.memory_space<vmem>>, vector<8x128xf32>
    tpu.vector_store %arg3[%c0_23, %c0_24], %55 {strides = array<i32>} : memref<8x256xf32, #tpu.memory_space<vmem>>, vector<8x128xf32>,
    %c0_25 = arith.constant 0 : index
    %c128 = arith.constant 128 : index
    %66 = vector.load %arg3[%c0_25, %c128] : memref<8x256xf32, #tpu.memory_space<vmem>>, vector<8x128xf32>
    tpu.vector_store %arg3[%c0_25, %c128], %64 {strides = array<i32>} : memref<8x256xf32, #tpu.memory_space<vmem>>, vector<8x128xf32>,
    return
  }
  func.func @transform_0(%arg0: i32) -> (i32, i32) {
    %c0_i32 = arith.constant 0 : i32
    %c0_i32_0 = arith.constant 0 : i32
    return %arg0, %c0_i32 : i32, i32
  }
  func.func @transform_1(%arg0: i32) -> (i32, i32) {
    %c0_i32 = arith.constant 0 : i32
    %c0_i32_0 = arith.constant 0 : i32
    %c0_i32_1 = arith.constant 0 : i32
    return %c0_i32, %c0_i32_0 : i32, i32
  }
  func.func @transform_2(%arg0: i32) -> (i32, i32) {
    %c0_i32 = arith.constant 0 : i32
    %c0_i32_0 = arith.constant 0 : i32
    return %arg0, %c0_i32 : i32, i32
  }
}

</mosaic_0001>

<bundles_post_ra>
// kernel: tpu_custom_call.1
= control target key start
LH: loop header
LB: loop body
LE: loop exit
PB: predicated region body
PF: predicated region fallthrough
CT: control target
= control target key end

     0   :  { %7 = vsyncpa [#allocation3], 0  ;;  %s801_s0 = inlined_call_operand.hbm [shape: f32[16,32], index: 0, kind: input, shape index: {}]   ;;  %s802_s1 = inlined_call_operand.hbm [shape: f32[32,128], index: 1, kind: input, shape index: {}]   ;;  %s803_s2 = inlined_call_operand.hbm [shape: f32[16,256], index: 2, kind: output, shape index: {}]  }
   0x1   :  { %9 = vsyncpa [#allocation3 + $0x1], 0 }
   0x2   :  { %10 = vsyncpa [#allocation6], 0 }
   0x3   :  { %11 = vsyncpa [#allocation4], 0 }
   0x4   :  { %13 = vsyncpa [#allocation4 + $0x1], 0  ;;  %s634_s9 = smov 0   ;;  %s636_s10 = smov 0  }
   0x5   :  { %s638_s11 = smov 0   ;;  %s640_s12 = smov 0  }
   0x6 LB: > { %s655_s13 = sadd.s32 4294967295, %s610_s12   ;;  %s390_s14 = sadd.s32 4294967294, %s610_s12   ;;  %s610_s12 = sphi %s640_s12, %s825_s12   ;;  %s606_s11 = sphi %s638_s11, %s824_s11   ;;  %s602_s10 = sphi %s636_s10, %s823_s10   ;;  %s598_s9 = sphi %s634_s9, %s822_s9  }
   0x7   : > { %p39_p0 = scmp.ne.s32.totalorder %s602_s10, %s598_s9  ;;  %p804_p1 = scmp.eq.s32.totalorder %s655_s13, 0 }
   0x8   : > { %p90_p3 = scmp.eq.s32.totalorder %s390_s14, 1  ;;  %p391_p5 = scmp.ge.s32.totalorder %s610_s12, 1 }
   0x9   : > { %p664_p4 = por %p804_p1, %p39_p0  ;;  %p97_p7 = scmp.lt.s32.totalorder %s610_s12, 3 }
   0xa   : > { %p669_p6 = por %p90_p3, %p39_p0  ;;  %s612_s18 = smov [#allocation5]  }
   0xb   : > { %s808_s15 = scalar_select %p664_p4, 1, 0 }
   0xc   : > { %s809_s16 = scalar_select %p669_p6, 1, 0 }
   0xd   : > { %p674_p8 = pnand %p391_p5, %p97_p7  ;;  %s109_s19 = sshll.u32 %s612_s18, 4  ;;  %s110_s19 = int_to_ptr.vmem [resolvable:$true] %s109_s19 }
   0xe   : > { %s688_s21 = sadd.s32 1, %s610_s12   ;;  %s26_s22 = sadd.s32 1, %s606_s11 }
   0xf   : > { %s810_s17 = scalar_select %p674_p8, 1, 0 }
  0x10   : > { %p435_p9 = pneg %p674_p8  ;;  %s23_s23 = ssub.s32 %s610_s12, %s688_s21 }
  0x11   : > { %s499_s24 = scalar_lea.vmem %s110_s19, 512  ;;  %p507_p5 = scmp.lt.s32.totalorder %s110_s19, %s110_s19 }
  0x12   : > { %p683_p11 = pnand %p435_p9, %p804_p1  ;;  %p500_p13 = scmp.ne.s32.totalorder %s110_s19, %s499_s24 }
  0x13   : > { %p508_p7 = scmp.lt.s32.totalorder %s499_s24, %s499_s24 }
  0x14   : > { %p490_p12 = pneg %p683_p11 }
  0x15   : > { %p509_p10 = por %p508_p7, %p507_p5 }
  0x16   : > { %p502_p0 = pnand %p500_p13, %p490_p12 }
  0x18   : > { %p503_p3 = pneg %p502_p0 }
  0x1a   : > { %p510_p2 = pnand %p509_p10, %p503_p3 }
  0x1c   : > { %513 = shalt.err (!%p510_p2)
}
  0x1d   : > { %s613_s25 = smov 128   ;;  %s614_s26 = smov 8  }
  0x1e   : > { %438 = dma.hbm_to_vmem [thread:$0]  (!%p683_p11), %s802_s1, 512, %s110_s19, [#allocation6], %s613_s25, %s613_s25, %s614_s26  }
  0x1f   : > { %p24_p9 = scmp.eq.s32.totalorder %s23_s23, 0  ;;  %p33_p12 = scmp.ne.s32.totalorder %s606_s11, %s602_s10 }
  0x20   : > { %p34_p10 = scmp.eq.s32.totalorder %s610_s12, 0  ;;  %p448_p2 = scmp.lt.s32.totalorder %s610_s12, 2 }
  0x21   : > { %s705_s29 = scalar_select %p24_p9, %s606_s11, %s26_s22  }
  0x22   : > { %p35_p13 = por %p34_p10, %p33_p12  ;;  %p812_p0 = scmp.eq.s32.totalorder %s655_s13, 1 }
  0x23   : > { %s123_s3 = sand.u32 1, %s606_s11   ;;  %s395_s4 = sshll.u32 %s610_s12, 7 }
  0x24   : > { %p709_p3 = por %p812_p0, %p33_p12  ;;  %s394_s5 = sshll.u32 %s123_s3, 3 }
  0x25   : > { %s718_s8 = scalar_lea.hbm %s801_s0, %s395_s4  ;;  %s127_s14 = scalar_lea.vmem [#allocation2], %s394_s5 }
  0x26   : > { %s813_s30 = scalar_select %p709_p3, 1, 0 }
  0x27   : > { %s134_s18 = sshll.u32 %s127_s14, 4  ;;  %p720_p11 = pnand %p448_p2, %p35_p13  ;;  %s135_s18 = int_to_ptr.vmem [resolvable:$true] %s134_s18 }
  0x28   : > { %s124_s20 = scalar_lea.sflag [#allocation3], %s123_s3  ;;  %s514_s22 = scalar_lea.hbm %s718_s8, 128 }
  0x29   : > { %p515_p5 = scmp.ne.s32.totalorder %s718_s8, %s514_s22  ;;  %p516_p7 = pneg %p720_p11 }
  0x2a   : > { %s519_s25 = scalar_lea.hbm %s801_s0, 256  ;;  %p520_p10 = scmp.lt.s32.totalorder %s718_s8, %s801_s0 }
  0x2b   : > { %p517_p9 = pnand %p516_p7, %p515_p5  ;;  %p521_p2 = scmp.lt.s32.totalorder %s519_s25, %s514_s22 }
  0x2d   : > { %p518_p12 = pneg %p517_p9  ;;  %p522_p13 = por %p521_p2, %p520_p10 }
  0x2f   : > { %p523_p0 = pnand %p522_p13, %p518_p12 }
  0x31   : > { %526 = shalt.err (!%p523_p0)
}
  0x32   : > { %s527_s28 = scalar_lea.vmem %s135_s18, 128  ;;  %s615_s3 = smov [#allocation2]  }
  0x33   : > { %p528_p1 = scmp.ne.s32.totalorder %s135_s18, %s527_s28  ;;  %s532_s4 = sshll.u32 %s615_s3, 4  ;;  %s533_s4 = int_to_ptr.vmem [resolvable:$false] %s532_s4 }
  0x34   : > { %s534_s5 = scalar_lea.vmem %s533_s4, 256  ;;  %p535_p5 = scmp.lt.s32.totalorder %s135_s18, %s533_s4 }
  0x35   : > { %p530_p6 = pnand %p528_p1, %p516_p7  ;;  %p536_p9 = scmp.lt.s32.totalorder %s534_s5, %s527_s28 }
  0x37   : > { %p531_p3 = pneg %p530_p6  ;;  %p537_p4 = por %p536_p9, %p535_p5 }
  0x39   : > { %p538_p8 = pnand %p537_p4, %p531_p3 }
  0x3b   : > { %541 = shalt.err (!%p538_p8)
}
  0x3c   : > { %442 = dma.hbm_to_vmem [thread:$0]  (!%p720_p11), %s718_s8, 128, %s135_s18, %s124_s20  }
  0x3d   : > { %p815_p12 = scmp.ne.s32.totalorder %s810_s17, 0 }
  0x3e   : > { %s741_s6 = sand.u32 (!%p815_p12), 1, %s602_s10   ;;  %p816_p1 = scmp.ne.s32.totalorder (!%p815_p12), %s808_s15, 0 }
  0x3f   : > { %143 = sbr.rel (%p815_p12) target bundleno = 319 (0x13f), region = 28  ;;  %s397_s7 = sshll.u32 (!%p815_p12), %s741_s6, 3 }
  0x40   : > { %s146_s14 = scalar_lea.sflag (!%p815_p12), [#allocation3], %s741_s6  ;;  %s149_s22 = scalar_lea.vmem (!%p815_p12), [#allocation2], %s397_s7 }
  0x44   : > { %585 = dma.done.wait (%p816_p1), %s146_s14, 128  }
  0x45   : > { %587 = vsyncadd (%p816_p1), %s146_s14, 4294967168  ;;  %p817_p4 = scmp.eq.s32.totalorder %s655_s13, 0 }
  0x47   : > { %589 = dma.done.wait (%p817_p4), [#allocation6], 512   ;;  %p818_p6 = pmov %p817_p4 }
  0x48   : > { %v616_v0 = vmov 0.0   ;;  %vm617_vm0 = vmmov 0   ;;  %v178_v1 = vld [vmem:[#allocation5 + $0x18] sm:$0xff]  ;;  %v177_v2 = vld [vmem:[#allocation5 + $0x10] sm:$0xff]  ;;  %v176_v3 = vld [vmem:[#allocation5 + $0x8] sm:$0xff]  ;;  %vm179_vm1 = vcmask 261120  }
  0x49   : > { %591 = vsyncadd (%p818_p6), [#allocation6], 4294966784  ;;  %414 = vmatprep.subr.mxu0 %v616_v0  ;;  %422 = vmatprep.mubr.msk.f32.mxu0 %vm617_vm0, %v616_v0  ;;  %v175_v4 = vld [vmem:[#allocation5] sm:$0xff]  ;;  %v174_v5 = vld [vmem:[%s149_s22] sm:$0xff]  ;;  %s399_s15 = sshll.u32 %s741_s6, 4  ;;  %s408_s17 = sshll.u32 %s655_s13, 8 }
  0x4a   : > { %415 = vmatpush3.msra.mxu0 %v178_v1  ;;  %s173_s8 = scalar_lea.vmem [#allocation7], %s399_s15  ;;  %s758_s23 = scalar_lea.hbm %s803_s2, %s408_s17 }
  0x4b   : > { %416 = vmatprep.subr.mxu0 %v616_v0  ;;  %s310_s18 = sshll.u32 %s173_s8, 4  ;;  %s296_s13 = scalar_lea.sflag [#allocation4], %s741_s6  ;;  %s760_s18 = int_to_ptr.vmem [resolvable:$true] %s310_s18 }
  0x4c   : > { %417 = vmatpush3.msra.mxu0 %v177_v2  ;;  %s542_s24 = scalar_lea.vmem %s760_s18, 256  ;;  %p819_p3 = scmp.ne.s32.totalorder %s813_s30, 0 }
  0x4d   : > { %418 = vmatprep.subr.mxu0 %v616_v0  ;;  %p543_p8 = scmp.ne.s32.totalorder %s760_s18, %s542_s24  ;;  %s618_s25 = smov [#allocation7]  }
  0x4e   : > { %419 = vmatpush3.msra.mxu0 %v176_v3  ;;  %s546_s26 = sshll.u32 %s618_s25, 4  ;;  %s547_s26 = int_to_ptr.vmem [resolvable:$false] %s546_s26 }
  0x4f   : > { %420 = vmatprep.subr.mxu0 %v616_v0  ;;  %p544_p11 = pnand %p543_p8, %p819_p3  ;;  %s548_s27 = scalar_lea.vmem %s547_s26, 512 }
  0x50   : > { %421 = vmatpush3.msra.mxu0 %v175_v4  ;;  %p549_p10 = scmp.lt.s32.totalorder %s760_s18, %s547_s26  ;;  %p550_p2 = scmp.lt.s32.totalorder %s548_s27, %s542_s24 }
  0x51   : > { %423 = vmatmul.mubr.msk.f32.vlgmr.msra.gmra.mxu0 %vm179_vm1, %v174_v5  ;;  %p545_p7 = pneg %p544_p11 }
  0x52   : > { %p551_p13 = por %p550_p2, %p549_p10 }
  0x54   : > { %p552_p0 = pnand %p551_p13, %p545_p7 }
 0x111   : > { %v249_v6 = vpop.f32.mrf.mxu0 }
 0x112   : > { %v253_v7 = vmul.f32 0.63661975, %v249_v6 }
 0x113   : > { %v424_v8 = vpop.f32.mrf.mxu0 }
 0x114   : > { %v254_v9 = vadd.f32 0.5, %v253_v7 }
 0x116   : > { %v255_v10 = vfloor.f32 %v254_v9 }
 0x118   : > { %v256_v11 = vmul.f32 1.5703125, %v255_v10  ;;  %v258_v13 = vmul.f32 0.0004837513, %v255_v10  ;;  %v260_v15 = vmul.f32 7.54979e-08, %v255_v10  ;;  %v425_v18 = vtrunc.f32 %v255_v10 }
 0x11a   : > { %v257_v12 = vsub.f32 %v249_v6, %v256_v11  ;;  %v426_v22 = vcvt.f32.s32 %v425_v18 }
 0x11c   : > { %v259_v14 = vsub.f32 %v257_v12, %v258_v13  ;;  %v288_v31 = vadd.s32 1, %v426_v22  ;;  %v280_v33 = vand.u32 1, %v426_v22  ;;  %v284_v38 = vand.u32 2, %v426_v22 }
 0x11e   : > { %v261_v16 = vsub.f32 %v259_v14, %v260_v15  ;;  %v289_v39 = vand.u32 2, %v288_v31  ;;  %vm281_vm2 = vcmp.eq.s32.totalorder %v280_v33, 1  ;;  %vm285_vm3 = vcmp.eq.s32.totalorder %v284_v38, 2 }
 0x120   : > { %v263_v17 = vmul.f32 %v261_v16, %v261_v16  ;;  %vm290_vm4 = vcmp.eq.s32.totalorder %v289_v39, 2 }
 0x122   : > { %v265_v19 = vmul.f32 -0.00019515296, %v263_v17  ;;  %v274_v20 = vmul.f32 2.4433157e-05, %v263_v17  ;;  %v271_v25 = vmul.f32 0.5, %v263_v17  ;;  %v264_v27 = vmul.f32 %v263_v17, %v261_v16 }
 0x123   : > { %v273_v29 = vmul.f32 %v263_v17, %v263_v17 }
 0x124   : > { %v266_v21 = vadd.f32 0.008332161, %v265_v19  ;;  %v402_v23 = vadd.f32 -0.0013887316, %v274_v20  ;;  %v272_v34 = vsub.f32 1.0, %v271_v25 }
 0x126   : > { %v267_v24 = vmul.f32 %v266_v21, %v263_v17  ;;  %v276_v26 = vmul.f32 %v402_v23, %v263_v17 }
 0x128   : > { %v401_v28 = vadd.f32 -0.16666655, %v267_v24  ;;  %v277_v30 = vadd.f32 0.041666646, %v276_v26 }
 0x12a   : > { %v269_v32 = vmul.f32 %v401_v28, %v264_v27  ;;  %v278_v35 = vmul.f32 %v277_v30, %v273_v29 }
 0x12c   : > { %v270_v36 = vadd.f32 %v269_v32, %v261_v16  ;;  %v279_v37 = vadd.f32 %v278_v35, %v272_v34 }
 0x12e   : > { %v282_v40 = vsel %vm281_vm2, %v279_v37, %v270_v36  ;;  %v283_v41 = vsel %vm281_vm2, %v270_v36, %v279_v37 }
 0x12f   : > { %v286_v42 = vsub.f32 0.0, %v282_v40  ;;  %v291_v43 = vsub.f32 0.0, %v283_v41 }
 0x131   : > { %v287_v44 = vsel %vm285_vm3, %v286_v42, %v282_v40  ;;  %v292_v45 = vsel %vm290_vm4, %v291_v43, %v283_v41 }
 0x132   : > { %293 = vst [vmem:[%s173_s8] sm:$0xff] %v287_v44  ;;  %294 = vst [vmem:[%s173_s8 + $0x8] sm:$0xff] %v292_v45 }
 0x133   : > { %555 = shalt.err (!%p552_p0)
}
 0x134   : > { %s556_s28 = scalar_lea.hbm %s758_s23, 256  ;;  %s560_s5 = scalar_lea.hbm %s803_s2, 512 }
 0x135   : > { %p557_p5 = scmp.ne.s32.totalorder %s758_s23, %s556_s28  ;;  %p561_p1 = scmp.lt.s32.totalorder %s758_s23, %s803_s2 }
 0x136   : > { %p562_p4 = scmp.lt.s32.totalorder %s560_s5, %s556_s28 }
 0x137   : > { %p558_p9 = pnand %p557_p5, %p819_p3 }
 0x138   : > { %p563_p6 = por %p562_p4, %p561_p1 }
 0x139   : > { %p559_p12 = pneg %p558_p9 }
 0x13b   : > { %p564_p8 = pnand %p563_p6, %p559_p12 }
 0x13d   : > { %567 = shalt.err (!%p564_p8)
}
 0x13e   : > { %433 = dma.vmem_to_hbm [thread:$0]  (%p819_p3), %s760_s18, 256, %s758_s23, %s296_s13  }
 0x13f PF: > { %s322_s14 = sand.u32 1, %s598_s9   ;;  %p820_p11 = scmp.ne.s32.totalorder %s809_s16, 0 }
 0x140   : > { %p821_p7 = scmp.ge.s32.totalorder %s610_s12, 2  ;;  %s323_s22 = scalar_lea.sflag [#allocation4], %s322_s14 }
 0x142   : > { %p444_p10 = pnand %p821_p7, %p820_p11 }
 0x144   : > { %p445_p2 = pneg %p444_p10 }
 0x146   : > { %593 = dma.done.wait (%p445_p2), %s323_s22, 256  }
 0x147   : > { %595 = vsyncadd (%p445_p2), %s323_s22, 4294967040  ;;  %p16_p13 = scmp.ge.s32.totalorder %s688_s21, 4   ;;  %s822_s9 = smov %s602_s10 }
 0x148   : > { %s823_s10 = smov %s606_s11  ;;  %s824_s11 = smov %s705_s29 }
 0x149   : > { %s825_s12 = smov %s688_s21  ;;  %18 = sbr.rel (!%p16_p13) target bundleno = 6 (0x6), region = 77 }
 0x14e   :  { %328 = vsyncpa [#allocation3], 1 }
 0x14f   :  { %330 = vsyncpa [#allocation3 + $0x1], 1 }
 0x150   :  { %331 = vsyncpa [#allocation6], 1 }
 0x151   :  { %332 = vsyncpa [#allocation4], 1 }
 0x152   :  { %334 = vsyncpa [#allocation4 + $0x1], 1 }

</bundles_post_ra>
